<compile_context>
chip_gen: v7x
topology: tpu7x:2x2x1
jax: 0.10.0
libtpu: 0.0.40
codegen_flags: <defaults>
</compile_context>

<pallas_src>
import functools

import jax
import jax.numpy as jnp
import numpy as np
from jax.experimental import pallas as pl
from jax.experimental.pallas import tpu as pltpu


def _round_up(x, m):
    return ((x + m - 1) // m) * m


def _spiking_dense_kernel(tj_ref, w_ref, bias_ref, out_ref, acc_ref, *,
                          t_max, negate, clamp):
    """One (tm, tn) output tile of SpikingDense, accumulated over the K grid axis.

    tj_ref:   (tm, tk) spike-time tile
    w_ref:    (tk, tn) weight tile
    bias_ref: (1, tn)  folded affine bias
    out_ref:  (tm, tn) output spike times
    acc_ref:  (tm, tn) fp32 scratch accumulator (persists across K steps)
    """
    k = pl.program_id(2)

    @pl.when(k == 0)
    def _init():
        acc_ref[...] = jnp.zeros_like(acc_ref)

    acc_ref[...] += jnp.dot(tj_ref[...], w_ref[...],
                            preferred_element_type=jnp.float32)

    @pl.when(k == pl.num_programs(2) - 1)
    def _finalize():
        acc = acc_ref[...]
        if negate:                      # outputLayer: (t_min - tj) @ W  ==  -(tj @ W) + const
            acc = -acc
        ti = acc + bias_ref[...]        # (1, tn) broadcasts over rows
        if clamp:
            ti = jnp.where(ti < t_max, ti, t_max)
        out_ref[...] = ti.astype(out_ref.dtype)


def spiking_dense(tj, kernel, d_i, *, t_min=0.0, t_max=1.0, t_min_prev=0.0,
                  output_layer=False, noise=0.0,
                  tm_target=512, tn_target=512, tk_target=512):
    """Forward pass of SpikingDense.

    tj:     (M, K) float32 input spike times
    kernel: (K, N) float32 weights
    d_i:    (N,)   float32 D_i
    returns (M, N) float32 spike times (or membrane potentials for output_layer=True)
    """
    # TODO(synk): noise > 0 branch not implemented (module default robustness_params noise=0).
    del noise

    tj = jnp.asarray(tj, jnp.float32)
    kernel = jnp.asarray(kernel, jnp.float32)
    d_i = jnp.asarray(d_i, jnp.float32)

    M, K = tj.shape
    Kw, N = kernel.shape
    assert K == Kw, (K, Kw)

    t_min = float(t_min)
    t_max = float(t_max)
    t_min_prev = float(t_min_prev)

    colsum = jnp.sum(kernel, axis=0)  # (N,)
    if not output_layer:
        # (tj - t_min)@W + (t_max - t_min - D_i) + t_min  ==  tj@W + bias
        bias = t_max - d_i - t_min * colsum
        negate, clamp = False, True
    else:
        # alpha*(t_min - t_min_prev) + (t_min - tj)@W  ==  -(tj@W) + bias
        # (alpha kept explicit so t_min == t_min_prev reproduces torch's NaN behaviour)
        alpha = d_i / (t_min - t_min_prev)
        bias = alpha * (t_min - t_min_prev) + t_min * colsum
        negate, clamp = True, False

    # --- tile selection: largest tile <= target, aligned to (sublane=8, lane=128) ---
    tm = min(tm_target, _round_up(M, 8))
    tn = min(tn_target, _round_up(N, 128))
    tk = min(tk_target, _round_up(K, 128))
    Mp, Kp, Np = _round_up(M, tm), _round_up(K, tk), _round_up(N, tn)

    if (Mp, Kp) != (M, K):
        tj = jnp.pad(tj, ((0, Mp - M), (0, Kp - K)))
    if (Kp, Np) != (K, N):
        kernel = jnp.pad(kernel, ((0, Kp - K), (0, Np - N)))
    bias2 = jnp.pad(bias.reshape(1, N), ((0, 0), (0, Np - N)))

    kernel_fn = functools.partial(_spiking_dense_kernel, t_max=t_max,
                                  negate=negate, clamp=clamp)

    out = pl.pallas_call(
        kernel_fn,
        out_shape=jax.ShapeDtypeStruct((Mp, Np), jnp.float32),
        grid_spec=pltpu.PrefetchScalarGridSpec(
            num_scalar_prefetch=0,
            grid=(Mp // tm, Np // tn, Kp // tk),
            in_specs=[
                pl.BlockSpec((tm, tk), lambda i, j, k: (i, k)),  # spike times
                pl.BlockSpec((tk, tn), lambda i, j, k: (k, j)),  # weights
                pl.BlockSpec((1, tn), lambda i, j, k: (0, j)),   # folded bias (tiny)
            ],
            out_specs=pl.BlockSpec((tm, tn), lambda i, j, k: (i, j)),
            scratch_shapes=[pltpu.VMEM((tm, tn), jnp.float32)],
        ),
        compiler_params=pltpu.CompilerParams(
            dimension_semantics=("parallel", "parallel", "arbitrary")),
    )(tj, kernel, bias2)

    return out[:M, :N]


if __name__ == "__main__":
    key = jax.random.PRNGKey(0)
    k1, k2, k3, k4, k5, k6, k7, k8, k9 = jax.random.split(key, 9)

    # --- case 1: hidden-layer SpikingDense, TPU-friendly small shapes (lane-dense out) ---
    B, K, N = 16, 256, 128
    t_min, t_max = 0.0, 1.0                       # module defaults
    W = jax.random.normal(k1, (K, N), dtype=jnp.float32) * 0.1
    D = jax.random.normal(k2, (N,), dtype=jnp.float32) * 0.1
    tj = jax.random.uniform(k3, (B, K), dtype=jnp.float32, minval=t_min, maxval=t_max)

    ti = jax.block_until_ready(spiking_dense(tj, W, D, t_min=t_min, t_max=t_max))
    ref = (tj - t_min) @ W + (t_max - t_min - D) + t_min
    ref = jnp.where(ref < t_max, ref, t_max)
    np.testing.assert_allclose(np.asarray(ti), np.asarray(ref), rtol=1e-5, atol=1e-4)

    # --- case 2: ragged / non-aligned shapes + nonzero t_min (exercises padding & bias fold) ---
    B2, K2, N2 = 10, 100, 40
    t_min2, t_max2 = 0.2, 1.7
    W2 = jax.random.normal(k4, (K2, N2), dtype=jnp.float32) * 0.1
    D2 = jax.random.normal(k5, (N2,), dtype=jnp.float32) * 0.1
    tj2 = jax.random.uniform(k6, (B2, K2), dtype=jnp.float32, minval=t_min2, maxval=t_max2)

    ti2 = jax.block_until_ready(spiking_dense(tj2, W2, D2, t_min=t_min2, t_max=t_max2))
    ref2 = (tj2 - t_min2) @ W2 + (t_max2 - t_min2 - D2) + t_min2
    ref2 = jnp.where(ref2 < t_max2, ref2, t_max2)
    np.testing.assert_allclose(np.asarray(ti2), np.asarray(ref2), rtol=1e-5, atol=1e-4)

    # --- case 3: outputLayer branch (membrane potential, no clamp) ---
    t_min_prev3, t_min3, t_max3 = 0.0, 1.0, 2.5
    W3 = jax.random.normal(k7, (K, N), dtype=jnp.float32) * 0.1
    D3 = jax.random.normal(k8, (N,), dtype=jnp.float32) * 0.1
    tj3 = jax.random.uniform(k9, (B, K), dtype=jnp.float32, minval=t_min3, maxval=t_max3)

    out3 = jax.block_until_ready(
        spiking_dense(tj3, W3, D3, t_min=t_min3, t_max=t_max3,
                      t_min_prev=t_min_prev3, output_layer=True))
    alpha3 = D3 / (t_min3 - t_min_prev3)
    ref3 = alpha3 * (t_min3 - t_min_prev3) + (t_min3 - tj3) @ W3
    np.testing.assert_allclose(np.asarray(out3), np.asarray(ref3), rtol=1e-5, atol=1e-4)

    print("KERNEL_OK")
</pallas_src>

<mosaic_0001>
module attributes {stable_mosaic.version = 11 : i64} {
  func.func @_spiking_dense_kernel(%arg0: i32, %arg1: i32, %arg2: i32, %arg3: memref<16x256xf32, #tpu.memory_space<vmem>>, %arg4: memref<256x128xf32, #tpu.memory_space<vmem>>, %arg5: memref<1x128xf32, #tpu.memory_space<vmem>>, %arg6: memref<16x128xf32, #tpu.memory_space<vmem>>, %arg7: memref<16x128xf32, #tpu.memory_space<vmem>>) attributes {dimension_semantics = [#tpu.dimension_semantics<parallel>, #tpu.dimension_semantics<parallel>, #tpu.dimension_semantics<arbitrary>], iteration_bounds = array<i64: 1, 1, 1>, scalar_prefetch = 0 : i64, scratch_operands = 1 : i64, tpu.core_type = #tpu.core_type<tc>, window_params = [{transform_indices = @transform_0, window_bounds = array<i64: 16, 256>}, {transform_indices = @transform_1, window_bounds = array<i64: 256, 128>}, {transform_indices = @transform_2, window_bounds = array<i64: 1, 128>}, {transform_indices = @transform_3, window_bounds = array<i64: 16, 128>}]} {
    %c0_i32 = arith.constant 0 : i32
    %0 = arith.cmpi eq, %arg2, %c0_i32 : i32
    %1 = arith.extui %0 : i1 to i32
    %c0_i32_0 = arith.constant 0 : i32
    %2 = arith.cmpi ne, %1, %c0_i32_0 : i32
    scf.if %2 {
      %cst_10 = arith.constant 0.000000e+00 : f32
      %12 = vector.broadcast %cst_10 : f32 to vector<16x128xf32>
      %c0_11 = arith.constant 0 : index
      %c0_12 = arith.constant 0 : index
      %13 = vector.load %arg7[%c0_11, %c0_12] : memref<16x128xf32, #tpu.memory_space<vmem>>, vector<16x128xf32>
      tpu.vector_store %arg7[%c0_11, %c0_12], %12 {strides = array<i32>} : memref<16x128xf32, #tpu.memory_space<vmem>>, vector<16x128xf32>,
    } else {
    }
    %c0 = arith.constant 0 : index
    %c0_1 = arith.constant 0 : index
    %3 = vector.load %arg7[%c0, %c0_1] : memref<16x128xf32, #tpu.memory_space<vmem>>, vector<16x128xf32>
    %c0_2 = arith.constant 0 : index
    %c0_3 = arith.constant 0 : index
    %4 = vector.load %arg3[%c0_2, %c0_3] : memref<16x256xf32, #tpu.memory_space<vmem>>, vector<16x256xf32>
    %c0_4 = arith.constant 0 : index
    %c0_5 = arith.constant 0 : index
    %5 = vector.load %arg4[%c0_4, %c0_5] : memref<256x128xf32, #tpu.memory_space<vmem>>, vector<256x128xf32>
    %cst = arith.constant dense<0.000000e+00> : vector<16x128xf32>
    %6 = tpu.matmul %4, %5, %cst {dimension_numbers = #tpu.dot_dimension_numbers<[1], [0], [0], [1], [0, 0, 1, 1], [], []>} : vector<16x256xf32>, vector<256x128xf32>, vector<16x128xf32> -> vector<16x128xf32>
    %7 = arith.addf %3, %6 : vector<16x128xf32>
    %c0_6 = arith.constant 0 : index
    %c0_7 = arith.constant 0 : index
    %8 = vector.load %arg7[%c0_6, %c0_7] : memref<16x128xf32, #tpu.memory_space<vmem>>, vector<16x128xf32>
    tpu.vector_store %arg7[%c0_6, %c0_7], %7 {strides = array<i32>} : memref<16x128xf32, #tpu.memory_space<vmem>>, vector<16x128xf32>,
    %c0_i32_8 = arith.constant 0 : i32
    %9 = arith.cmpi eq, %arg2, %c0_i32_8 : i32
    %10 = arith.extui %9 : i1 to i32
    %c0_i32_9 = arith.constant 0 : i32
    %11 = arith.cmpi ne, %10, %c0_i32_9 : i32
    scf.if %11 {
      %c0_10 = arith.constant 0 : index
      %c0_11 = arith.constant 0 : index
      %12 = vector.load %arg7[%c0_10, %c0_11] : memref<16x128xf32, #tpu.memory_space<vmem>>, vector<16x128xf32>
      %c0_12 = arith.constant 0 : index
      %c0_13 = arith.constant 0 : index
      %13 = vector.load %arg5[%c0_12, %c0_13] : memref<1x128xf32, #tpu.memory_space<vmem>>, vector<1x128xf32>
      %14 = vector.broadcast %13 : vector<1x128xf32> to vector<16x128xf32>
      %15 = arith.addf %12, %14 : vector<16x128xf32>
      %cst_14 = arith.constant 1.000000e+00 : f32
      %16 = vector.broadcast %cst_14 : f32 to vector<16x128xf32>
      %17 = arith.cmpf olt, %15, %16 : vector<16x128xf32>
      %cst_15 = arith.constant 1.000000e+00 : f32
      %18 = vector.broadcast %cst_15 : f32 to vector<16x128xf32>
      %19 = arith.select %17, %15, %18 : vector<16x128xi1>, vector<16x128xf32>
      %c0_16 = arith.constant 0 : index
      %c0_17 = arith.constant 0 : index
      %20 = vector.load %arg6[%c0_16, %c0_17] : memref<16x128xf32, #tpu.memory_space<vmem>>, vector<16x128xf32>
      tpu.vector_store %arg6[%c0_16, %c0_17], %19 {strides = array<i32>} : memref<16x128xf32, #tpu.memory_space<vmem>>, vector<16x128xf32>,
    } else {
    }
    return
  }
  func.func @transform_0(%arg0: i32, %arg1: i32, %arg2: i32) -> (i32, i32) {
    %c0_i32 = arith.constant 0 : i32
    return %arg0, %arg2 : i32, i32
  }
  func.func @transform_1(%arg0: i32, %arg1: i32, %arg2: i32) -> (i32, i32) {
    %c0_i32 = arith.constant 0 : i32
    return %arg2, %arg1 : i32, i32
  }
  func.func @transform_2(%arg0: i32, %arg1: i32, %arg2: i32) -> (i32, i32) {
    %c0_i32 = arith.constant 0 : i32
    %c0_i32_0 = arith.constant 0 : i32
    return %c0_i32, %arg1 : i32, i32
  }
  func.func @transform_3(%arg0: i32, %arg1: i32, %arg2: i32) -> (i32, i32) {
    %c0_i32 = arith.constant 0 : i32
    return %arg0, %arg1 : i32, i32
  }
}

</mosaic_0001>

<bundles_post_ra>
// kernel: tpu_custom_call.1
= control target key start
LH: loop header
LB: loop body
LE: loop exit
PB: predicated region body
PF: predicated region fallthrough
CT: control target
= control target key end

     0   :  { %8 = vsyncpa [#allocation4], 0  ;;  %s442_s0 = inlined_call_operand.hbm [shape: f32[16,256], index: 0, kind: input, shape index: {}]   ;;  %s443_s1 = inlined_call_operand.hbm [shape: f32[256,128], index: 1, kind: input, shape index: {}]   ;;  %s444_s2 = inlined_call_operand.vmem [shape: f32[1,128], index: 2, kind: input, shape index: {}]   ;;  %s445_s3 = inlined_call_operand.hbm [shape: f32[16,128], index: 3, kind: output, shape index: {}]  }
   0x1   :  { %9 = vsyncpa [#allocation7], 0 }
   0x2   :  { %10 = vsyncpa [#allocation5], 0  ;;  %s370_s12 = smov [#allocation3]   ;;  %s298_s16 = scalar_lea.hbm %s442_s0, 512 }
   0x3   :  { %s16_s13 = sshll.u32 %s370_s12, 4  ;;  %p299_p0 = scmp.ne.s32.totalorder %s442_s0, %s298_s16  ;;  %s17_s13 = int_to_ptr.vmem [resolvable:$true] %s16_s13 }
   0x4   :  { %p302_p1 = scmp.lt.u32.totalorder %s298_s16, %s442_s0 }
   0x6   :  { %p304_p2 = pnand %p302_p1, %p299_p0 }
   0x8   :  { %307 = shalt.err (!%p304_p2)
}
   0x9   :  { %s308_s21 = scalar_lea.vmem %s17_s13, 512  ;;  %p313_p4 = scmp.lt.s32.totalorder %s17_s13, %s17_s13 }
   0xa   :  { %p309_p3 = scmp.ne.s32.totalorder %s17_s13, %s308_s21  ;;  %p314_p5 = scmp.lt.s32.totalorder %s308_s21, %s308_s21 }
   0xc   :  { %p315_p6 = por %p314_p5, %p313_p4 }
   0xe   :  { %p316_p7 = pnand %p315_p6, %p309_p3 }
  0x10   :  { %319 = shalt.err (!%p316_p7)
}
  0x11   :  { %s371_s22 = smov 256   ;;  %s372_s23 = smov 16  }
  0x12   :  { %22 = dma.hbm_to_vmem [thread:$0]  %s442_s0, 512, %s17_s13, [#allocation4], %s371_s22, %s371_s22, %s372_s23  }
  0x13   :  { %s373_s26 = smov [#allocation6]   ;;  %s320_s30 = scalar_lea.hbm %s443_s1, 4096 }
  0x14   :  { %s28_s27 = sshll.u32 %s373_s26, 4  ;;  %p321_p8 = scmp.ne.s32.totalorder %s443_s1, %s320_s30  ;;  %s29_s27 = int_to_ptr.vmem [resolvable:$true] %s28_s27 }
  0x15   :  { %p324_p9 = scmp.lt.u32.totalorder %s320_s30, %s443_s1 }
  0x17   :  { %p326_p10 = pnand %p324_p9, %p321_p8 }
  0x19   :  { %329 = shalt.err (!%p326_p10)
}
  0x1a   :  { %s330_s8 = scalar_lea.vmem %s29_s27, 4096  ;;  %p335_p12 = scmp.lt.s32.totalorder %s29_s27, %s29_s27 }
  0x1b   :  { %p331_p11 = scmp.ne.s32.totalorder %s29_s27, %s330_s8  ;;  %p336_p13 = scmp.lt.s32.totalorder %s330_s8, %s330_s8 }
  0x1d   :  { %p337_p0 = por %p336_p13, %p335_p12 }
  0x1f   :  { %p338_p1 = pnand %p337_p0, %p331_p11 }
  0x21   :  { %341 = shalt.err (!%p338_p1)
}
  0x22   :  { %s374_s0 = smov 128   ;;  %s375_s9 = smov 8  }
  0x23   :  { %34 = dma.hbm_to_vmem [thread:$0]  %s443_s1, 4096, %s29_s27, [#allocation7], %s374_s0, %s374_s0, %s375_s9  }
  0x24   :  { %364 = dma.done.wait [#allocation4], 512  }
  0x25   :  { %365 = vsyncadd [#allocation4], 4294966784 }
  0x26   :  { %366 = dma.done.wait [#allocation7], 4096  }
  0x27   :  { %367 = vsyncadd [#allocation7], 4294963200  ;;  %v71_v0 = vld [vmem:[#allocation6 + $0x80] sm:$0xff]  ;;  %v72_v1 = vld [vmem:[#allocation6 + $0x88] sm:$0xff]  ;;  %s376_s13 = smov [#allocation8]  }
  0x28   :  { %v55_v2 = vld [vmem:[#allocation6] sm:$0xff]  ;;  %v243_v3 = vpack.c.bf16 %v72_v1, %v71_v0  ;;  %v56_v4 = vld [vmem:[#allocation6 + $0x8] sm:$0xff]  ;;  %v73_v5 = vld [vmem:[#allocation6 + $0x90] sm:$0xff]  ;;  %s191_s14 = sshll.u32 %s376_s13, 4  ;;  %s192_s14 = int_to_ptr.vmem [resolvable:$true] %s191_s14 }
  0x29   :  { %v74_v6 = vld [vmem:[#allocation6 + $0x98] sm:$0xff]  ;;  %v245_v7 = vpack.c.bf16 %v56_v4, %v55_v2  ;;  %v57_v9 = vld [vmem:[#allocation6 + $0x10] sm:$0xff]  ;;  %v75_v11 = vld [vmem:[#allocation6 + $0xa0] sm:$0xff]  ;;  %s342_s15 = scalar_lea.vmem %s192_s14, 256  ;;  %p347_p3 = scmp.lt.s32.totalorder %s192_s14, %s192_s14 }
  0x2a   :  { %v247_v8 = vpack.c.bf16 %v74_v6, %v73_v5  ;;  %v58_v10 = vld [vmem:[#allocation6 + $0x18] sm:$0xff]  ;;  %244 = vmatprep.subr.bf16.mxu0 %v243_v3  ;;  %275 = vmatprep.subr.bf16.mxu1 %v243_v3  ;;  %v76_v12 = vld [vmem:[#allocation6 + $0xa8] sm:$0xff]  ;;  %v59_v15 = vld [vmem:[#allocation6 + $0x20] sm:$0xff]  ;;  %p343_p2 = scmp.ne.s32.totalorder %s192_s14, %s342_s15  ;;  %p348_p4 = scmp.lt.s32.totalorder %s342_s15, %s342_s15 }
  0x2b   :  { %246 = vmatpush3.bf16.msra.mxu0 %v245_v7  ;;  %283 = vmatpush3.bf16.msra.mxu1 %v245_v7  ;;  %v249_v13 = vpack.c.bf16 %v58_v10, %v57_v9  ;;  %v251_v14 = vpack.c.bf16 %v76_v12, %v75_v11  ;;  %v60_v16 = vld [vmem:[#allocation6 + $0x28] sm:$0xff]  ;;  %v77_v17 = vld [vmem:[#allocation6 + $0xb0] sm:$0xff]  ;;  %v78_v18 = vld [vmem:[#allocation6 + $0xb8] sm:$0xff] }
  0x2c   :  { %248 = vmatprep.subr.bf16.mxu0 %v247_v8  ;;  %276 = vmatprep.subr.bf16.mxu1 %v247_v8  ;;  %v253_v19 = vpack.c.bf16 %v60_v16, %v59_v15  ;;  %v255_v20 = vpack.c.bf16 %v78_v18, %v77_v17  ;;  %v61_v21 = vld [vmem:[#allocation6 + $0x30] sm:$0xff]  ;;  %v62_v22 = vld [vmem:[#allocation6 + $0x38] sm:$0xff]  ;;  %v79_v23 = vld [vmem:[#allocation6 + $0xc0] sm:$0xff]  ;;  %p349_p5 = por %p348_p4, %p347_p3 }
  0x2d   :  { %v80_v24 = vld [vmem:[#allocation6 + $0xc8] sm:$0xff]  ;;  %v54_v26 = vld [vmem:[#allocation3 + $0x18] sm:$0xff]  ;;  %v257_v27 = vpack.c.bf16 %v62_v22, %v61_v21  ;;  %v63_v29 = vld [vmem:[#allocation6 + $0x40] sm:$0xff] }
  0x2e   :  { %v52_v25 = vld [vmem:[#allocation3 + $0x8] sm:$0xff]  ;;  %v259_v28 = vpack.c.bf16 %v80_v24, %v79_v23  ;;  %v81_v31 = vld [vmem:[#allocation6 + $0xd0] sm:$0xff]  ;;  %v82_v32 = vld [vmem:[#allocation6 + $0xd8] sm:$0xff]  ;;  %156 = vmatprep.mubr.f32.mxu1 %v54_v26  ;;  %p350_p6 = pnand %p349_p5, %p343_p2 }
  0x2f   :  { %250 = vmatpush3.bf16.msra.mxu0 %v249_v13  ;;  %284 = vmatpush3.bf16.msra.mxu1 %v249_v13  ;;  %v64_v30 = vld [vmem:[#allocation6 + $0x48] sm:$0xff]  ;;  %v263_v34 = vpack.c.bf16 %v82_v32, %v81_v31  ;;  %v65_v35 = vld [vmem:[#allocation6 + $0x50] sm:$0xff]  ;;  %v66_v36 = vld [vmem:[#allocation6 + $0x58] sm:$0xff] }
  0x30   :  { %252 = vmatprep.subr.bf16.mxu0 %v251_v14  ;;  %277 = vmatprep.subr.bf16.mxu1 %v251_v14  ;;  %v261_v33 = vpack.c.bf16 %v64_v30, %v63_v29  ;;  %v83_v37 = vld [vmem:[#allocation6 + $0xe0] sm:$0xff]  ;;  %v84_v38 = vld [vmem:[#allocation6 + $0xe8] sm:$0xff]  ;;  %v265_v39 = vpack.c.bf16 %v66_v36, %v65_v35  ;;  %v85_v43 = vld [vmem:[#allocation6 + $0xf0] sm:$0xff] }
  0x31   :  { %151 = vmatprep.mubr.f32.mxu0 %v52_v25  ;;  %v267_v40 = vpack.c.bf16 %v84_v38, %v83_v37  ;;  %v67_v41 = vld [vmem:[#allocation6 + $0x60] sm:$0xff]  ;;  %v68_v42 = vld [vmem:[#allocation6 + $0x68] sm:$0xff]  ;;  %v86_v44 = vld [vmem:[#allocation6 + $0xf8] sm:$0xff] }
  0x32   :  { %v269_v45 = vpack.c.bf16 %v68_v42, %v67_v41  ;;  %v271_v46 = vpack.c.bf16 %v86_v44, %v85_v43  ;;  %v69_v47 = vld [vmem:[#allocation6 + $0x70] sm:$0xff]  ;;  %v70_v48 = vld [vmem:[#allocation6 + $0x78] sm:$0xff]  ;;  %v51_v50 = vld [vmem:[#allocation3] sm:$0xff] }
  0x33   :  { %254 = vmatpush3.bf16.msra.mxu0 %v253_v19  ;;  %285 = vmatpush3.bf16.msra.mxu1 %v253_v19  ;;  %v273_v49 = vpack.c.bf16 %v70_v48, %v69_v47  ;;  %v53_v51 = vld [vmem:[#allocation3 + $0x10] sm:$0xff]  ;;  %v204_v55 = vld [vmem:[%s444_s2] ss:$0 sm:$0xff] }
  0x34   :  { %256 = vmatprep.subr.bf16.mxu0 %v255_v20  ;;  %278 = vmatprep.subr.bf16.mxu1 %v255_v20 }
  0x37   :  { %258 = vmatpush3.bf16.msra.mxu0 %v257_v27  ;;  %286 = vmatpush3.bf16.msra.mxu1 %v257_v27 }
  0x38   :  { %260 = vmatprep.subr.bf16.mxu0 %v259_v28  ;;  %279 = vmatprep.subr.bf16.mxu1 %v259_v28 }
  0x3b   :  { %262 = vmatpush3.bf16.msra.mxu0 %v261_v33  ;;  %287 = vmatpush3.bf16.msra.mxu1 %v261_v33 }
  0x3c   :  { %264 = vmatprep.subr.bf16.mxu0 %v263_v34  ;;  %280 = vmatprep.subr.bf16.mxu1 %v263_v34 }
  0x3f   :  { %266 = vmatpush3.bf16.msra.mxu0 %v265_v39  ;;  %288 = vmatpush3.bf16.msra.mxu1 %v265_v39 }
  0x40   :  { %268 = vmatprep.subr.bf16.mxu0 %v267_v40  ;;  %281 = vmatprep.subr.bf16.mxu1 %v267_v40 }
  0x43   :  { %270 = vmatpush3.bf16.msra.mxu0 %v269_v45  ;;  %289 = vmatpush3.bf16.msra.mxu1 %v269_v45 }
  0x44   :  { %272 = vmatprep.subr.bf16.mxu0 %v271_v46  ;;  %282 = vmatprep.subr.bf16.mxu1 %v271_v46 }
  0x47   :  { %274 = vmatpush3.bf16.msra.mxu0 %v273_v49  ;;  %290 = vmatpush3.bf16.msra.mxu1 %v273_v49 }
  0x4a   :  { %152 = vmatmul.mubr.f32.vlgmr.msra.gmra.mrb[0].mxu0 %v51_v50  ;;  %157 = vmatmul.mubr.f32.vlgmr.msra.gmra.mrb[0].mxu1 %v53_v51 }
 0x11d   :  { %v237_v52 = vpop.f32.mrb[0].mxu0  ;;  %v240_v53 = vpop.f32.mrb[0].mxu1 }
 0x11e   :  { %v238_v54 = vpop.f32.mrb[1].mxu0  ;;  %v241_v56 = vpop.f32.mrb[1].mxu1 }
 0x11f   :  { %v239_v57 = vadd.f32 %v238_v54, %v237_v52  ;;  %v242_v58 = vadd.f32 %v241_v56, %v240_v53 }
 0x121   :  { %v178_v59 = vadd.f32 %v239_v57, %v204_v55  ;;  %v179_v60 = vadd.f32 %v242_v58, %v204_v55 }
 0x123   :  { %vm180_vm0 = vcmp.lt.f32.partialorder %v178_v59, 1.0  ;;  %vm181_vm1 = vcmp.lt.f32.partialorder %v179_v60, 1.0 }
 0x124   :  { %v182_v61 = vsel %vm180_vm0, %v178_v59, 1.0  ;;  %v183_v62 = vsel %vm181_vm1, %v179_v60, 1.0 }
 0x125   :  { %184 = vst [vmem:[#allocation8] sm:$0xff] %v182_v61  ;;  %185 = vst [vmem:[#allocation8 + $0x8] sm:$0xff] %v183_v62 }
 0x126   :  { %353 = shalt.err (!%p350_p6)
}
 0x127   :  { %s354_s17 = scalar_lea.hbm %s445_s3, 256 }
 0x128   :  { %p355_p7 = scmp.ne.s32.totalorder %s445_s3, %s354_s17  ;;  %p358_p8 = scmp.lt.u32.totalorder %s354_s17, %s445_s3 }
 0x12a   :  { %p360_p9 = pnand %p358_p8, %p355_p7 }
 0x12c   :  { %363 = shalt.err (!%p360_p9)
}
 0x12d   :  { %197 = dma.vmem_to_hbm [thread:$0]  %s192_s14, 256, %s445_s3, [#allocation5], %s374_s0, %s374_s0, %s375_s9  }
 0x12e   :  { %368 = dma.done.wait [#allocation5], 256  }
 0x12f   :  { %369 = vsyncadd [#allocation5], 4294967040 }
 0x130   :  { %201 = vsyncpa [#allocation4], 1 }
 0x131   :  { %202 = vsyncpa [#allocation7], 1 }
 0x132   :  { %203 = vsyncpa [#allocation5], 1 }

</bundles_post_ra>
